<compile_context>
chip_gen: v6e
topology: v6e:2x2x1
jax: 0.10.0
libtpu: 0.0.40
codegen_flags: <defaults>
</compile_context>

<pallas_src>
import functools

import jax
import jax.numpy as jnp
from jax import lax
from jax.experimental import pallas as pl
from jax.experimental.pallas import tpu as pltpu


# ----------------------------------------------------------------------------
# Hardware-aware knobs
# ----------------------------------------------------------------------------
@functools.lru_cache(maxsize=None)
def _vmem_limit_bytes():
    """Per-generation scoped-VMEM limit: 3/4 of physical, capped at 96 MiB.
    -> ~48 MiB on v7x (64 MiB physical), 96 MiB on v5e/v6e (128 MiB)."""
    cap = 64 * 1024 * 1024
    try:
        cap = int(getattr(pltpu.get_tpu_info(), "vmem_capacity_bytes", cap))
    except Exception:
        pass
    return int(min(cap * 3 // 4, 96 * 1024 * 1024))


def _sublane_align(dtype):
    # minimum second-to-last tile dim: 8 (f32), 16 (bf16), 32 (int8/fp8)
    return max(8, 32 // jnp.dtype(dtype).itemsize)


def _pick_tile(dim, target, align):
    """Largest tile <= target that is `align`-aligned and divides `dim`; else full dim."""
    if dim <= target:
        return dim
    t = (target // align) * align
    while t >= align:
        if dim % t == 0:
            return t
        t -= align
    return dim


def _pick_head_group(num_heads, head_dim, max_lanes=512):
    """Heads per grid step: largest divisor of num_heads whose channel width is a
    128-lane multiple (<= max_lanes); fall back to all heads (block == full C)."""
    best = None
    for g in range(1, num_heads + 1):
        if num_heads % g:
            continue
        lanes = g * head_dim
        if lanes > max_lanes:
            break
        if lanes % 128 == 0:
            best = g
    return best if best is not None else num_heads


# ----------------------------------------------------------------------------
# Tiled linear kernel: y = x @ W^T + b
# (MXU operands optionally bf16, f32 accumulation in VMEM scratch)
# ----------------------------------------------------------------------------
def _linear_kernel(x_ref, w_ref, b_ref, o_ref, acc_ref, *, compute_dtype):
    kk = pl.program_id(2)

    @pl.when(kk == 0)
    def _():
        acc_ref[...] = jnp.zeros_like(acc_ref)

    # Contract last dims of both operands (== x @ W^T): the MXU consumes the
    # transposed operand directly -- no materialized .T.
    acc_ref[...] += lax.dot_general(
        x_ref[...].astype(compute_dtype), w_ref[...].astype(compute_dtype),
        dimension_numbers=(((1,), (1,)), ((), ())),
        preferred_element_type=jnp.float32)

    @pl.when(kk == pl.num_programs(2) - 1)
    def _():
        o_ref[...] = (acc_ref[...] + b_ref[...].astype(jnp.float32)).astype(o_ref.dtype)


def pallas_linear(x2d, w, b, *, compute_dtype=jnp.float32):
    M, Cin = x2d.shape
    Cout = w.shape[0]
    tm = _pick_tile(M, 512, _sublane_align(x2d.dtype))
    tn = _pick_tile(Cout, 512, 128)
    tk = _pick_tile(Cin, 1024, 128)
    grid = (M // tm, Cout // tn, Cin // tk)
    kern = functools.partial(_linear_kernel, compute_dtype=compute_dtype)
    return pl.pallas_call(
        kern,
        out_shape=jax.ShapeDtypeStruct((M, Cout), x2d.dtype),
        grid=grid,
        in_specs=[
            pl.BlockSpec((tm, tk), lambda i, j, k: (i, k)),
            pl.BlockSpec((tn, tk), lambda i, j, k: (j, k)),
            pl.BlockSpec((1, tn), lambda i, j, k: (0, j)),
        ],
        out_specs=pl.BlockSpec((tm, tn), lambda i, j, k: (i, j)),
        scratch_shapes=[pltpu.VMEM((tm, tn), jnp.float32)],
        compiler_params=pltpu.CompilerParams(
            dimension_semantics=("parallel", "parallel", "arbitrary"),
            vmem_limit_bytes=_vmem_limit_bytes()),
    )(x2d, w, b.reshape(1, Cout))


# ----------------------------------------------------------------------------
# Flash-style attention core.
# Grid: (B, head_group, q_tile, kv_tile); kv axis is the (arbitrary) reduction.
# q/k/v blocks are lane-dense head-group slabs selected by the DMA; the output
# block is the matching lane-dense (tq, group*hd) slab, resident across kv.
# ----------------------------------------------------------------------------
def _flash_attn_kernel(q_ref, k_ref, v_ref, o_ref,
                       qn_sc, m_sc, l_sc, acc_sc, *,
                       heads, head_dim, scale, compute_dtype):
    ki = pl.program_id(3)
    nkv = pl.num_programs(3)

    # torch.std default is unbiased (divide by hd-1).  head_dim == 1 would divide
    # by zero in torch too -- guarded here to avoid a hard NaN in the kernel.
    denom = jnp.float32(head_dim - 1 if head_dim > 1 else 1)

    def _standardize(a):  # (rows, hd) f32 -> zero-mean, unit (unbiased) std
        mu = jnp.mean(a, axis=-1, keepdims=True)
        ac = a - mu
        inv_std = lax.rsqrt(jnp.sum(ac * ac, axis=-1, keepdims=True) / denom)  # EUP
        return ac * inv_std

    # --- once per (batch, head-group, q-tile): init online-softmax state and
    #     standardize + pre-scale q (folds `scale` into q, not the NxN scores).
    @pl.when(ki == 0)
    def _():
        m_sc[...] = jnp.full(m_sc.shape, -jnp.inf, m_sc.dtype)
        l_sc[...] = jnp.zeros(l_sc.shape, l_sc.dtype)
        acc_sc[...] = jnp.zeros(acc_sc.shape, acc_sc.dtype)
        for h in range(heads):
            qh = q_ref[0, :, h * head_dim:(h + 1) * head_dim].astype(jnp.float32)
            qn_sc[h] = (_standardize(qh) * scale).astype(qn_sc.dtype)

    # --- per kv tile: per-head online-softmax update; each head's partial result
    #     accumulates straight into its scratch slot (no python list / concat).
    # TODO(synk): for very large head counts, a batched (G, N, hd) einsum over a
    # pre-shaped head-major layout would keep the MXU pipeline fuller per call.
    for h in range(heads):
        lo, hi = h * head_dim, (h + 1) * head_dim
        kn = _standardize(k_ref[0, :, lo:hi].astype(jnp.float32)).astype(compute_dtype)
        vh = v_ref[0, :, lo:hi].astype(compute_dtype)

        # qn @ kn^T: contract last dims of both operands directly on the MXU.
        s = lax.dot_general(
            qn_sc[h].astype(compute_dtype), kn,
            dimension_numbers=(((1,), (1,)), ((), ())),
            preferred_element_type=jnp.float32)              # (tq, tkv)

        m_prev = m_sc[h]
        m_new = jnp.maximum(m_prev, jnp.max(s, axis=-1, keepdims=True))
        alpha = jnp.exp(m_prev - m_new)
        p = jnp.exp(s - m_new)
        l_sc[h] = alpha * l_sc[h] + jnp.sum(p, axis=-1, keepdims=True)
        acc_sc[h] = alpha * acc_sc[h] + jnp.dot(
            p.astype(compute_dtype), vh, preferred_element_type=jnp.float32)
        m_sc[h] = m_new

    # --- last kv tile: normalize and fill this head-group's lane-dense output slab.
    @pl.when(ki == nkv - 1)
    def _():
        for h in range(heads):
            inv = pl.reciprocal(l_sc[h], approx=True)        # EUP
            inv = inv * (2.0 - l_sc[h] * inv)                # one Newton step -> f32 exact
            o_ref[0, :, h * head_dim:(h + 1) * head_dim] = (
                acc_sc[h] * inv).astype(o_ref.dtype)


def pallas_flash_attention(q, k, v, num_heads, *, out_dtype, compute_dtype=jnp.float32):
    B, N, C = q.shape
    hd = C // num_heads
    scale = float(hd) ** (-0.5)
    hpg = _pick_head_group(num_heads, hd)     # heads per grid step (lane-aligned group)
    ngroups = num_heads // hpg
    ghd = hpg * hd
    sub = _sublane_align(q.dtype)
    tq = _pick_tile(N, 256, sub)
    tkv = _pick_tile(N, 256, sub)
    grid = (B, ngroups, N // tq, N // tkv)

    kern = functools.partial(
        _flash_attn_kernel, heads=hpg, head_dim=hd, scale=scale,
        compute_dtype=compute_dtype)

    blk_q = pl.BlockSpec((1, tq, ghd), lambda b, g, qi, ki: (b, qi, g))
    blk_kv = pl.BlockSpec((1, tkv, ghd), lambda b, g, qi, ki: (b, ki, g))
    # TODO(synk): if the deployed C stays < 128 (it is 32 in this test), fold
    # several batches / N-row groups per grid step so the HBM writeback slab is a
    # >=128-lane multiple; moot when production C is already a 128 multiple.
    return pl.pallas_call(
        kern,
        out_shape=jax.ShapeDtypeStruct((B, N, C), out_dtype),
        grid=grid,
        in_specs=[blk_q, blk_kv, blk_kv],
        out_specs=pl.BlockSpec((1, tq, ghd), lambda b, g, qi, ki: (b, qi, g)),
        scratch_shapes=[
            pltpu.VMEM((hpg, tq, hd), compute_dtype),   # standardized * scaled q
            pltpu.VMEM((hpg, tq, 1), jnp.float32),      # running row max
            pltpu.VMEM((hpg, tq, 1), jnp.float32),      # running softmax denom
            pltpu.VMEM((hpg, tq, hd), jnp.float32),     # running numerator (acc)
        ],
        compiler_params=pltpu.CompilerParams(
            dimension_semantics=("parallel", "parallel", "parallel", "arbitrary"),
            vmem_limit_bytes=_vmem_limit_bytes()),
    )(q, k, v)


# ----------------------------------------------------------------------------
# Full module forward
# ----------------------------------------------------------------------------
def attention_forward(x, params, num_heads, *, compute_dtype=jnp.float32):
    B, N, C = x.shape
    x2d = x.reshape(B * N, C)

    # qkv projection as three tiled GEMMs.  Same HBM traffic as one fused 3C GEMM,
    # but yields separate (B, N, C) q/k/v arrays so the attention BlockSpecs can
    # carve lane-aligned head-group blocks without any strided channel split.
    # (torch's qkv channel order is [3][H][hd] -> rows 0:C / C:2C / 2C:3C of W.)
    w_qkv, b_qkv = params["w_qkv"], params["b_qkv"]
    q = pallas_linear(x2d, w_qkv[0 * C:1 * C], b_qkv[0 * C:1 * C], compute_dtype=compute_dtype)
    k = pallas_linear(x2d, w_qkv[1 * C:2 * C], b_qkv[1 * C:2 * C], compute_dtype=compute_dtype)
    v = pallas_linear(x2d, w_qkv[2 * C:3 * C], b_qkv[2 * C:3 * C], compute_dtype=compute_dtype)
    q = q.reshape(B, N, C)
    k = k.reshape(B, N, C)
    v = v.reshape(B, N, C)

    # attention hot path: flash-style, lane-dense (B, N, C) output, no transposes.
    o = pallas_flash_attention(q, k, v, num_heads, out_dtype=x.dtype,
                               compute_dtype=compute_dtype)

    # output projection (tiled Pallas GEMM)
    y = pallas_linear(o.reshape(B * N, C), params["w_proj"], params["b_proj"],
                      compute_dtype=compute_dtype)
    return y.reshape(B, N, C)


# ----------------------------------------------------------------------------
# Pure-JAX reference (mirrors the PyTorch forward) for the correctness check.
# ----------------------------------------------------------------------------
def attention_reference(x, params, num_heads):
    B, N, C = x.shape
    hd = C // num_heads
    scale = hd ** (-0.5)
    qkv = x @ params["w_qkv"].T + params["b_qkv"]
    qkv = qkv.reshape(B, N, 3, num_heads, hd).transpose(2, 0, 3, 1, 4)
    q, k, v = qkv[0], qkv[1], qkv[2]

    def std_unbiased(a):
        m = a.mean(-1, keepdims=True)
        return jnp.sqrt(((a - m) ** 2).sum(-1, keepdims=True) / (hd - 1))

    q = (q - q.mean(-1, keepdims=True)) / std_unbiased(q)
    k = (k - k.mean(-1, keepdims=True)) / std_unbiased(k)
    attn = jax.nn.softmax(jnp.einsum("bhnd,bhmd->bhnm", q, k) * scale, axis=-1)
    o = jnp.einsum("bhnm,bhmd->bhnd", attn, v)
    o = o.transpose(0, 2, 1, 3).reshape(B, N, C)
    return o @ params["w_proj"].T + params["b_proj"]


if __name__ == "__main__":
    # small shapes consistent with the module: dim divisible by num_heads
    B, N, C = 2, 8, 32
    num_heads = 8

    key = jax.random.PRNGKey(0)
    k_x, k_qkv, k_proj, k_bp = jax.random.split(key, 4)

    x = jax.random.normal(k_x, (B, N, C), dtype=jnp.float32)
    params = {
        # qkv_bias=False in the module -> zero bias
        "w_qkv": jax.random.normal(k_qkv, (3 * C, C), dtype=jnp.float32) * 0.05,
        "b_qkv": jnp.zeros((3 * C,), dtype=jnp.float32),
        "w_proj": jax.random.normal(k_proj, (C, C), dtype=jnp.float32) * 0.05,
        "b_proj": jax.random.normal(k_bp, (C,), dtype=jnp.float32) * 0.05,
    }

    y_ref = attention_reference(x, params, num_heads)

    # f32 MXU operands: tight check vs the pure-JAX reference.
    y = jax.block_until_ready(attention_forward(x, params, num_heads))
    assert y.shape == (B, N, C)
    assert jnp.allclose(y, y_ref, atol=1e-4, rtol=1e-4), "f32 kernel mismatch vs reference"

    # bf16 MXU operands with f32 accumulation: looser numerical check.
    y_bf16 = jax.block_until_ready(
        attention_forward(x, params, num_heads, compute_dtype=jnp.bfloat16))
    assert jnp.allclose(y_bf16, y_ref, atol=5e-2, rtol=5e-2), "bf16 kernel mismatch vs reference"

    # TODO(synk): the `reconstruct` diagnostics branch (phi-norm reconstruction
    # error bookkeeping) and `calculate_kpca` caching are stateful/off-by-default
    # and not part of the hot path; they are not implemented in the kernel.
    print("KERNEL_OK")
</pallas_src>

<mosaic_0001>
module attributes {stable_mosaic.version = 11 : i64} {
  func.func @_linear_kernel(%arg0: i32, %arg1: i32, %arg2: i32, %arg3: memref<16x32xf32, #tpu.memory_space<vmem>>, %arg4: memref<32x32xf32, #tpu.memory_space<vmem>>, %arg5: memref<1x32xf32, #tpu.memory_space<vmem>>, %arg6: memref<16x32xf32, #tpu.memory_space<vmem>>, %arg7: memref<16x32xf32, #tpu.memory_space<vmem>>) attributes {dimension_semantics = [#tpu.dimension_semantics<parallel>, #tpu.dimension_semantics<parallel>, #tpu.dimension_semantics<arbitrary>], iteration_bounds = array<i64: 1, 1, 1>, scalar_prefetch = 0 : i64, scratch_operands = 1 : i64, tpu.core_type = #tpu.core_type<tc>, window_params = [{transform_indices = @transform_0, window_bounds = array<i64: 16, 32>}, {transform_indices = @transform_1, window_bounds = array<i64: 32, 32>}, {transform_indices = @transform_2, window_bounds = array<i64: 1, 32>}, {transform_indices = @transform_3, window_bounds = array<i64: 16, 32>}]} {
    %c0_i32 = arith.constant 0 : i32
    %0 = arith.cmpi eq, %arg2, %c0_i32 : i32
    %1 = arith.extui %0 : i1 to i32
    %c0_i32_0 = arith.constant 0 : i32
    %2 = arith.cmpi ne, %1, %c0_i32_0 : i32
    scf.if %2 {
      %cst_10 = arith.constant 0.000000e+00 : f32
      %12 = vector.broadcast %cst_10 : f32 to vector<16x32xf32>
      %c0_11 = arith.constant 0 : index
      %c0_12 = arith.constant 0 : index
      %13 = vector.load %arg7[%c0_11, %c0_12] : memref<16x32xf32, #tpu.memory_space<vmem>>, vector<16x32xf32>
      tpu.vector_store %arg7[%c0_11, %c0_12], %12 {strides = array<i32>} : memref<16x32xf32, #tpu.memory_space<vmem>>, vector<16x32xf32>,
    } else {
    }
    %c0 = arith.constant 0 : index
    %c0_1 = arith.constant 0 : index
    %3 = vector.load %arg7[%c0, %c0_1] : memref<16x32xf32, #tpu.memory_space<vmem>>, vector<16x32xf32>
    %c0_2 = arith.constant 0 : index
    %c0_3 = arith.constant 0 : index
    %4 = vector.load %arg3[%c0_2, %c0_3] : memref<16x32xf32, #tpu.memory_space<vmem>>, vector<16x32xf32>
    %c0_4 = arith.constant 0 : index
    %c0_5 = arith.constant 0 : index
    %5 = vector.load %arg4[%c0_4, %c0_5] : memref<32x32xf32, #tpu.memory_space<vmem>>, vector<32x32xf32>
    %cst = arith.constant dense<0.000000e+00> : vector<16x32xf32>
    %6 = tpu.matmul %4, %5, %cst {dimension_numbers = #tpu.dot_dimension_numbers<[1], [1], [0], [0], [0, 0, 1, 0], [], []>} : vector<16x32xf32>, vector<32x32xf32>, vector<16x32xf32> -> vector<16x32xf32>
    %7 = arith.addf %3, %6 : vector<16x32xf32>
    %c0_6 = arith.constant 0 : index
    %c0_7 = arith.constant 0 : index
    %8 = vector.load %arg7[%c0_6, %c0_7] : memref<16x32xf32, #tpu.memory_space<vmem>>, vector<16x32xf32>
    tpu.vector_store %arg7[%c0_6, %c0_7], %7 {strides = array<i32>} : memref<16x32xf32, #tpu.memory_space<vmem>>, vector<16x32xf32>,
    %c0_i32_8 = arith.constant 0 : i32
    %9 = arith.cmpi eq, %arg2, %c0_i32_8 : i32
    %10 = arith.extui %9 : i1 to i32
    %c0_i32_9 = arith.constant 0 : i32
    %11 = arith.cmpi ne, %10, %c0_i32_9 : i32
    scf.if %11 {
      %c0_10 = arith.constant 0 : index
      %c0_11 = arith.constant 0 : index
      %12 = vector.load %arg7[%c0_10, %c0_11] : memref<16x32xf32, #tpu.memory_space<vmem>>, vector<16x32xf32>
      %c0_12 = arith.constant 0 : index
      %c0_13 = arith.constant 0 : index
      %13 = vector.load %arg5[%c0_12, %c0_13] : memref<1x32xf32, #tpu.memory_space<vmem>>, vector<1x32xf32>
      %14 = vector.broadcast %13 : vector<1x32xf32> to vector<16x32xf32>
      %15 = arith.addf %12, %14 : vector<16x32xf32>
      %c0_14 = arith.constant 0 : index
      %c0_15 = arith.constant 0 : index
      %16 = vector.load %arg6[%c0_14, %c0_15] : memref<16x32xf32, #tpu.memory_space<vmem>>, vector<16x32xf32>
      tpu.vector_store %arg6[%c0_14, %c0_15], %15 {strides = array<i32>} : memref<16x32xf32, #tpu.memory_space<vmem>>, vector<16x32xf32>,
    } else {
    }
    return
  }
  func.func @transform_0(%arg0: i32, %arg1: i32, %arg2: i32) -> (i32, i32) {
    %c0_i32 = arith.constant 0 : i32
    return %arg0, %arg2 : i32, i32
  }
  func.func @transform_1(%arg0: i32, %arg1: i32, %arg2: i32) -> (i32, i32) {
    %c0_i32 = arith.constant 0 : i32
    return %arg1, %arg2 : i32, i32
  }
  func.func @transform_2(%arg0: i32, %arg1: i32, %arg2: i32) -> (i32, i32) {
    %c0_i32 = arith.constant 0 : i32
    %c0_i32_0 = arith.constant 0 : i32
    return %c0_i32, %arg1 : i32, i32
  }
  func.func @transform_3(%arg0: i32, %arg1: i32, %arg2: i32) -> (i32, i32) {
    %c0_i32 = arith.constant 0 : i32
    return %arg0, %arg1 : i32, i32
  }
}

</mosaic_0001>

<bundles_post_ra>
// kernel: tpu_custom_call.1
= control target key start
LH: loop header
LB: loop body
LE: loop exit
PB: predicated region body
PF: predicated region fallthrough
CT: control target
= control target key end

     0   :  { %8 = vsyncpa [#allocation4], 0  ;;  %s349_s0 = inlined_call_operand.hbm [shape: f32[16,32], index: 0, kind: input, shape index: {}]   ;;  %s350_s1 = inlined_call_operand.hbm [shape: f32[32,32], index: 1, kind: input, shape index: {}]   ;;  %s351_s2 = inlined_call_operand.vmem [shape: f32[1,32], index: 2, kind: input, shape index: {}]   ;;  %s352_s3 = inlined_call_operand.hbm [shape: f32[16,32], index: 3, kind: output, shape index: {}]  }
   0x1   :  { %9 = vsyncpa [#allocation7], 0 }
   0x2   :  { %10 = vsyncpa [#allocation5], 0  ;;  %s286_s12 = smov [#allocation3]  }
   0x3   :  { %s16_s13 = sshll.u32 %s286_s12, 4  ;;  %s17_s13 = int_to_ptr.vmem [resolvable:$true] %s16_s13 }
   0x4   :  { %s228_s14 = scalar_lea.vmem %s17_s13, 256  ;;  %p233_p1 = scmp.lt.s32.totalorder %s17_s13, %s17_s13 }
   0x5   :  { %p229_p0 = scmp.ne.s32.totalorder %s17_s13, %s228_s14  ;;  %p234_p2 = scmp.lt.s32.totalorder %s228_s14, %s228_s14 }
   0x7   :  { %p235_p3 = por %p234_p2, %p233_p1 }
   0x9   :  { %p236_p4 = pnand %p235_p3, %p229_p0 }
   0xb   :  { %239 = shalt.err (!%p236_p4)
}
   0xc   :  { %s287_s15 = smov 128   ;;  %s288_s16 = smov 8  }
   0xd   :  { %22 = dma.hbm_to_vmem [thread:$0]  %s349_s0, 256, %s17_s13, [#allocation4], %s287_s15, %s287_s15, %s288_s16  }
   0xe   :  { %s289_s19 = smov [#allocation6]  }
   0xf   :  { %s28_s20 = sshll.u32 %s289_s19, 4  ;;  %s29_s20 = int_to_ptr.vmem [resolvable:$true] %s28_s20 }
  0x10   :  { %s248_s21 = scalar_lea.vmem %s29_s20, 512  ;;  %p253_p6 = scmp.lt.s32.totalorder %s29_s20, %s29_s20 }
  0x11   :  { %p249_p5 = scmp.ne.s32.totalorder %s29_s20, %s248_s21  ;;  %p254_p7 = scmp.lt.s32.totalorder %s248_s21, %s248_s21 }
  0x13   :  { %p255_p8 = por %p254_p7, %p253_p6 }
  0x15   :  { %p256_p9 = pnand %p255_p8, %p249_p5 }
  0x17   :  { %259 = shalt.err (!%p256_p9)
}
  0x18   :  { %34 = dma.hbm_to_vmem [thread:$0]  %s350_s1, 512, %s29_s20, [#allocation7], %s287_s15, %s287_s15, %s288_s16  }
  0x19   :  { %280 = dma.done.wait [#allocation4], 256  }
  0x1a   :  { %281 = vsyncadd [#allocation4], 4294967040 }
  0x1b   :  { %282 = dma.done.wait [#allocation7], 512  }
  0x1c   :  { %283 = vsyncadd [#allocation7], 4294966784  ;;  %vm47_vm0 = vcmask 261120   ;;  %v290_v0 = vmov 0.0   ;;  %v57_v1 = vld [vmem:[#allocation6 + $0x18] sm:$0xff]  ;;  %v56_v2 = vld [vmem:[#allocation6 + $0x10] sm:$0xff] }
  0x1d   :  { %49 = vst.msk [vmem:[#allocation2 + $0x8] sm:$0xff] %vm47_vm0, %v290_v0  ;;  %48 = vst.msk [vmem:[#allocation2] sm:$0xff] %vm47_vm0, %v290_v0  ;;  %203 = vmatprep.subr.msk.mxu0 %vm47_vm0, %v57_v1  ;;  %v52_v3 = vld [vmem:[#allocation3] sm:$0xff]  ;;  %v55_v4 = vld [vmem:[#allocation6 + $0x8] sm:$0xff]  ;;  %s291_s24 = smov [#allocation8]  }
  0x1e   :  { %204 = vmatpush3.xpose.msk.msra.mxu0 %vm47_vm0, %v57_v1  ;;  %211 = vmatprep.mubr.msk.f32.mxu0 %vm47_vm0, %v52_v3  ;;  %v54_v5 = vld [vmem:[#allocation6] sm:$0xff]  ;;  %v53_v6 = vld [vmem:[#allocation3 + $0x8] sm:$0xff]  ;;  %s177_s25 = sshll.u32 %s291_s24, 4  ;;  %s178_s25 = int_to_ptr.vmem [resolvable:$true] %s177_s25 }
  0x1f   :  { %205 = vmatprep.subr.msk.mxu0 %vm47_vm0, %v56_v2  ;;  %v196_v13 = vld [vmem:[%s351_s2] ss:$0 sm:$0xff]  ;;  %s260_s26 = scalar_lea.vmem %s178_s25, 256  ;;  %p265_p11 = scmp.lt.s32.totalorder %s178_s25, %s178_s25 }
  0x20   :  { %p261_p10 = scmp.ne.s32.totalorder %s178_s25, %s260_s26  ;;  %p266_p12 = scmp.lt.s32.totalorder %s260_s26, %s260_s26 }
  0x22   :  { %206 = vmatpush3.xpose.msk.msra.mxu0 %vm47_vm0, %v56_v2  ;;  %p267_p13 = por %p266_p12, %p265_p11 }
  0x23   :  { %207 = vmatprep.subr.msk.mxu0 %vm47_vm0, %v55_v4 }
  0x24   :  { %v51_v7 = vld [vmem:[#allocation2 + $0x8] sm:$0xff]  ;;  %v50_v9 = vld [vmem:[#allocation2] sm:$0xff]  ;;  %p268_p0 = pnand %p267_p13, %p261_p10 }
  0x26   :  { %208 = vmatpush3.xpose.msk.msra.mxu0 %vm47_vm0, %v55_v4 }
  0x27   :  { %209 = vmatprep.subr.msk.mxu0 %vm47_vm0, %v54_v5 }
  0x2a   :  { %210 = vmatpush3.xpose.msk.msra.mxu0 %vm47_vm0, %v54_v5 }
  0x2d   :  { %212 = vmatmul.mubr.msk.f32.vlgmr.msra.gmra.mxu0 %vm47_vm0, %v53_v6 }
  0xed   :  { %v213_v8 = vpop.f32.mrf.mxu0 }
  0xee   :  { %v153_v10 = vadd.f32 %v213_v8, %v51_v7 }
  0xef   :  { %v143_v11 = vpop.f32.mrf.mxu0 }
  0xf0   :  { %155 = vst.msk [vmem:[#allocation2 + $0x8] sm:$0xff] %vm47_vm0, %v153_v10  ;;  %v152_v12 = vadd.f32 %v143_v11, %v50_v9 }
  0xf2   :  { %154 = vst.msk [vmem:[#allocation2] sm:$0xff] %vm47_vm0, %v152_v12 }
  0xf7   :  { %v160_v14 = vld [vmem:[#allocation2 + $0x8] sm:$0xff] }
  0xf8   :  { %v169_v15 = vadd.f32 %v196_v13, %v160_v14 }
  0xf9   :  { %v159_v16 = vld [vmem:[#allocation2] sm:$0xff] }
  0xfa   :  { %v168_v17 = vadd.f32 %v196_v13, %v159_v16  ;;  %171 = vst.msk [vmem:[#allocation8 + $0x8] sm:$0xff] %vm47_vm0, %v169_v15 }
  0xfc   :  { %170 = vst.msk [vmem:[#allocation8] sm:$0xff] %vm47_vm0, %v168_v17 }
  0xfd   :  { %271 = shalt.err (!%p268_p0)
}
  0xfe   :  { %183 = dma.vmem_to_hbm [thread:$0]  %s178_s25, 256, %s352_s3, [#allocation5], %s287_s15, %s287_s15, %s288_s16  }
  0xff   :  { %284 = dma.done.wait [#allocation5], 256  }
 0x100   :  { %285 = vsyncadd [#allocation5], 4294967040 }
 0x101   :  { %187 = vsyncpa [#allocation4], 1 }
 0x102   :  { %188 = vsyncpa [#allocation7], 1 }
 0x103   :  { %189 = vsyncpa [#allocation5], 1 }

</bundles_post_ra>
